<compile_context>
chip_gen: v5e
topology: v5e:2x2
jax: 0.10.0
libtpu: 0.0.40
codegen_flags: <defaults>
</compile_context>

<pallas_src>
import functools

import jax
import jax.numpy as jnp
import numpy as np
from jax.experimental import pallas as pl
from jax.experimental.pallas import tpu as pltpu


# ---------------------------------------------------------------------------
# Pass 1: batch means of the four fused inputs (reduction over batch tiles).
# ---------------------------------------------------------------------------
def _stats_kernel(x12_ref, x13_ref, x23_ref, x123_ref,
                  m12_ref, m13_ref, m23_ref, m123_ref,
                  s12, s13, s23, s123, *, inv_n):
    i = pl.program_id(0)

    @pl.when(i == 0)
    def _init():
        s12[...] = jnp.zeros_like(s12)
        s13[...] = jnp.zeros_like(s13)
        s23[...] = jnp.zeros_like(s23)
        s123[...] = jnp.zeros_like(s123)

    f32 = jnp.float32
    # Exact f32 partial sums per batch tile. The kernel is HBM-bound; the
    # sublane reduce is nowhere near the saturating slot at these widths.
    s12[...] += jnp.sum(x12_ref[...].astype(f32), axis=0, keepdims=True)
    s13[...] += jnp.sum(x13_ref[...].astype(f32), axis=0, keepdims=True)
    s23[...] += jnp.sum(x23_ref[...].astype(f32), axis=0, keepdims=True)
    s123[...] += jnp.sum(x123_ref[...].astype(f32), axis=0, keepdims=True)

    @pl.when(i == pl.num_programs(0) - 1)
    def _finalize():
        m12_ref[...] = s12[...] * inv_n
        m13_ref[...] = s13[...] * inv_n
        m23_ref[...] = s23[...] * inv_n
        m123_ref[...] = s123[...] * inv_n


# ---------------------------------------------------------------------------
# Pass 2: global variance (reduction over batch tiles, two-stage reduce).
# ---------------------------------------------------------------------------
def _var_kernel(x123_ref, pcat_ref, m123_ref, r_ref, var_ref, colsum_ref, *, inv_n):
    i = pl.program_id(0)

    @pl.when(i == 0)
    def _init():
        colsum_ref[...] = jnp.zeros_like(colsum_ref)

    f32 = jnp.float32
    x = x123_ref[...].astype(f32)
    # Fused mean-correction: one (tb, d1+d2+d3) @ (d1+d2+d3, D123) MXU matmul
    # replaces three tile matmuls + three VPU multiplies + two adds.
    mean = m123_ref[...] + jnp.dot(pcat_ref[...], r_ref[...],
                                   preferred_element_type=f32)
    diff = x - mean
    # Stage 1: per-column partial sums of diff^2 (accumulated across B-tiles).
    colsum_ref[...] += jnp.sum(diff * diff, axis=0, keepdims=True)

    @pl.when(i == pl.num_programs(0) - 1)
    def _finalize():
        # Stage 2: single lane reduce, scalar var (sum((x-mean)^2) / B).
        var_ref[...] = jnp.sum(colsum_ref[...], axis=1, keepdims=True) * inv_n


# ---------------------------------------------------------------------------
# Pass 3: normalize (independent batch tiles -> "parallel" / megacore).
# ---------------------------------------------------------------------------
def _normalize_kernel(x123_ref, pcat_ref, m123_ref, r_ref, var_ref, y_ref, *, eps):
    f32 = jnp.float32
    x = x123_ref[...].astype(f32)
    mean = m123_ref[...] + jnp.dot(pcat_ref[...], r_ref[...],
                                   preferred_element_type=f32)
    inv = jax.lax.rsqrt(var_ref[...] + eps)            # (1, 1), broadcasts
    y_ref[...] = ((x - mean) * inv).astype(y_ref.dtype)


# ---------------------------------------------------------------------------
# Small host-side helpers (glue only).
# ---------------------------------------------------------------------------
@functools.lru_cache(maxsize=None)
def _tile_selectors(d1, d2, d3):
    """Static 0/1 'modulo' selector matrices (cached numpy, no per-call retrace)."""
    D123 = d1 * d2 * d3
    c = np.arange(D123)
    S1 = (c[None, :] % d1 == np.arange(d1)[:, None]).astype(np.float32)
    S2 = (c[None, :] % d2 == np.arange(d2)[:, None]).astype(np.float32)
    S3 = (c[None, :] % d3 == np.arange(d3)[:, None]).astype(np.float32)
    return S1, S2, S3


def _pick_batch_tile(batch, d123, itemsize, target_bytes=8 << 20):
    """Largest power-of-two batch tile (>=8 rows) dividing `batch` whose x123
    slab stays under `target_bytes` (keeps double-buffered blocks comfortably
    inside v7x's 64 MiB VMEM while using large tiles where the batch allows)."""
    cap = max(8, target_bytes // max(1, d123 * itemsize))
    for tb in (1024, 512, 256, 128, 64, 32, 16, 8):
        if tb <= batch and tb <= cap and batch % tb == 0:
            return tb
    return batch  # small / awkward batch: single full-batch block


def _vmem_limit_bytes(block_bytes):
    """Scoped-VMEM limit derived from actual block sizes (double-buffered) and
    the generation's physical VMEM (64 MiB v7x, 128 MiB v5e/v6e)."""
    try:
        cap = int(pltpu.get_tpu_info().vmem_capacity_bytes)
    except Exception:  # info unavailable -> assume the smallest (v7x)
        cap = 64 << 20
    want = 2 * int(block_bytes) + (4 << 20)
    return int(min(max(want, 16 << 20), (cap * 3) // 4))


# ---------------------------------------------------------------------------
# Forward wrapper.
# ---------------------------------------------------------------------------
def normalize3_forward(x12, x13, x23, x123, p1, p2, p3, *, eps=1e-5):
    """Pallas implementation of Normalize3.forward (training branch).

    Returns (y, mean_123, mean_12, mean_13, mean_23, var), with mean_* shaped
    (1, D_*) and var shaped (1, 1).
    """
    B, D123 = x123.shape
    D12, D13, D23 = x12.shape[1], x13.shape[1], x23.shape[1]
    d1, d2, d3 = p1.shape[1], p2.shape[1], p3.shape[1]
    assert D12 * d3 == D123 and D13 * d2 == D123 and D23 * d1 == D123
    d_tot = d1 + d2 + d3
    f32 = jnp.float32

    x_item = jnp.dtype(x123.dtype).itemsize
    tb = _pick_batch_tile(B, D123, x_item)
    nb = B // tb

    # -------- pass 1: batch means -------------------------------------------
    blk1 = (tb * (D12 + D13 + D23 + D123) * x_item
            + 2 * 4 * (D12 + D13 + D23 + D123))           # outputs + scratch
    m12, m13, m23, m123 = pl.pallas_call(
        functools.partial(_stats_kernel, inv_n=1.0 / B),
        out_shape=(jax.ShapeDtypeStruct((1, D12), f32),
                   jax.ShapeDtypeStruct((1, D13), f32),
                   jax.ShapeDtypeStruct((1, D23), f32),
                   jax.ShapeDtypeStruct((1, D123), f32)),
        grid=(nb,),
        in_specs=[pl.BlockSpec((tb, D12), lambda i: (i, 0)),
                  pl.BlockSpec((tb, D13), lambda i: (i, 0)),
                  pl.BlockSpec((tb, D23), lambda i: (i, 0)),
                  pl.BlockSpec((tb, D123), lambda i: (i, 0))],
        out_specs=(pl.BlockSpec((1, D12), lambda i: (0, 0)),
                   pl.BlockSpec((1, D13), lambda i: (0, 0)),
                   pl.BlockSpec((1, D23), lambda i: (0, 0)),
                   pl.BlockSpec((1, D123), lambda i: (0, 0))),
        scratch_shapes=[pltpu.VMEM((1, D12), f32),
                        pltpu.VMEM((1, D13), f32),
                        pltpu.VMEM((1, D23), f32),
                        pltpu.VMEM((1, D123), f32)],
        compiler_params=pltpu.CompilerParams(
            dimension_semantics=("arbitrary",),          # batch axis is a reduction
            vmem_limit_bytes=_vmem_limit_bytes(blk1)),
    )(x12, x13, x23, x123)

    # -------- glue: fold outer-product-flatten into one operator R ----------
    # mean[b,:] = m123 + p_cat[b,:] @ R, where each selector row is pre-scaled
    # by the "repeat" expansion of its partner batch mean. O(d_tot*D123) work,
    # done once per call; the kernels need one MXU matmul per tile and no
    # selector matrices in VMEM. Kept f32 for exact parity with the reference.
    S1, S2, S3 = _tile_selectors(d1, d2, d3)
    rep23 = jnp.repeat(m23[0], d1)       # rep for out_23_1: m23[c // d1]
    rep13 = jnp.repeat(m13[0], d2)       # rep for out_13_2: m13[c // d2]
    rep12 = jnp.repeat(m12[0], d3)       # rep for out_12_3: m12[c // d3]
    R = jnp.concatenate([S1 * rep23[None, :],
                         S2 * rep13[None, :],
                         S3 * rep12[None, :]], axis=0).astype(f32)  # (d_tot, D123)
    p_cat = jnp.concatenate([p1, p2, p3], axis=1).astype(f32)       # (B, d_tot)

    common_blk = (tb * D123 * x_item + tb * d_tot * 4
                  + D123 * 4 + d_tot * D123 * 4)

    # -------- pass 2: global variance ----------------------------------------
    var = pl.pallas_call(
        functools.partial(_var_kernel, inv_n=1.0 / B),
        out_shape=jax.ShapeDtypeStruct((1, 1), f32),
        grid=(nb,),
        in_specs=[pl.BlockSpec((tb, D123), lambda i: (i, 0)),
                  pl.BlockSpec((tb, d_tot), lambda i: (i, 0)),
                  pl.BlockSpec((1, D123), lambda i: (0, 0)),
                  pl.BlockSpec((d_tot, D123), lambda i: (0, 0))],
        out_specs=pl.BlockSpec((1, 1), lambda i: (0, 0)),
        scratch_shapes=[pltpu.VMEM((1, D123), f32)],
        compiler_params=pltpu.CompilerParams(
            dimension_semantics=("arbitrary",),          # var accumulates over batch
            vmem_limit_bytes=_vmem_limit_bytes(common_blk + D123 * 4)),
    )(x123, p_cat, m123, R)

    # -------- pass 3: normalize ----------------------------------------------
    y = pl.pallas_call(
        functools.partial(_normalize_kernel, eps=eps),
        out_shape=jax.ShapeDtypeStruct((B, D123), x123.dtype),
        grid=(nb,),
        in_specs=[pl.BlockSpec((tb, D123), lambda i: (i, 0)),
                  pl.BlockSpec((tb, d_tot), lambda i: (i, 0)),
                  pl.BlockSpec((1, D123), lambda i: (0, 0)),
                  pl.BlockSpec((d_tot, D123), lambda i: (0, 0)),
                  pl.BlockSpec((1, 1), lambda i: (0, 0))],
        out_specs=pl.BlockSpec((tb, D123), lambda i: (i, 0)),   # lane-dense blocks
        compiler_params=pltpu.CompilerParams(
            dimension_semantics=("parallel",),           # independent tiles -> v7x megacore
            vmem_limit_bytes=_vmem_limit_bytes(common_blk + tb * D123 * x_item)),
    )(x123, p_cat, m123, R, var)

    return y, m123, m12, m13, m23, var


# TODO(synk): running-stat EMA buffers / num_batches_tracked are module state,
# not kernel math — kept as plain-JAX glue below (matches the torch.no_grad block).
def update_running_stats(running, m123, m12, m13, m23, var, n, momentum=0.1):
    rm, rm12, rm13, rm23, rv = running
    f = momentum
    return (
        f * m123[0] + (1 - f) * rm,
        f * m12[0] + (1 - f) * rm12,
        f * m13[0] + (1 - f) * rm13,
        f * m23[0] + (1 - f) * rm23,
        f * var[0, 0] * n / (n - 1) + (1 - f) * rv,
    )


def normalize3_reference(x12, x13, x23, x123, p1, p2, p3, eps=1e-5):
    """Pure-JAX reference mirroring the PyTorch forward (training branch)."""
    B = x123.shape[0]
    m12 = x12.mean(0)
    m13 = x13.mean(0)
    m23 = x23.mean(0)
    m123 = x123.mean(0)
    out_12_3 = jnp.einsum("i,bj->bij", m12, p3).reshape(B, -1)
    out_13_2 = jnp.einsum("i,bj->bij", m13, p2).reshape(B, -1)
    out_23_1 = jnp.einsum("i,bj->bij", m23, p1).reshape(B, -1)
    mean = m123 + out_12_3 + out_13_2 + out_23_1
    var = jnp.sum((x123 - mean) ** 2) / B
    return (x123 - mean) / jnp.sqrt(var + eps)


if __name__ == "__main__":
    # feature_dim_dict = {'1':4, '2':4, '3':8, '12':16, '13':32, '23':32, '123':128}
    B, d1, d2, d3 = 8, 4, 4, 8
    D12, D13, D23 = d1 * d2, d1 * d3, d2 * d3
    D123 = d1 * d2 * d3
    eps = 1e-5

    key = jax.random.PRNGKey(0)
    k = jax.random.split(key, 7)
    x12 = jax.random.normal(k[0], (B, D12), jnp.float32)
    x13 = jax.random.normal(k[1], (B, D13), jnp.float32)
    x23 = jax.random.normal(k[2], (B, D23), jnp.float32)
    x123 = jax.random.normal(k[3], (B, D123), jnp.float32)
    p1 = jax.random.normal(k[4], (B, d1), jnp.float32)
    p2 = jax.random.normal(k[5], (B, d2), jnp.float32)
    p3 = jax.random.normal(k[6], (B, d3), jnp.float32)

    # Deterministic buffer init (matches reset_running_stats: zeros / ones).
    running = (
        jnp.zeros((D123,), jnp.float32),
        jnp.zeros((D12,), jnp.float32),
        jnp.zeros((D13,), jnp.float32),
        jnp.zeros((D23,), jnp.float32),
        jnp.ones((1,), jnp.float32),
    )

    y, m123, m12, m13, m23, var = jax.block_until_ready(
        normalize3_forward(x12, x13, x23, x123, p1, p2, p3, eps=eps)
    )
    _ = jax.block_until_ready(
        update_running_stats(running, m123, m12, m13, m23, var, B)
    )

    y_ref = normalize3_reference(x12, x13, x23, x123, p1, p2, p3, eps=eps)
    np.testing.assert_allclose(np.asarray(y), np.asarray(y_ref), rtol=1e-5, atol=1e-5)
    np.testing.assert_allclose(np.asarray(m123[0]), np.asarray(x123.mean(0)),
                               rtol=1e-5, atol=1e-5)

    print("KERNEL_OK")
</pallas_src>

<mosaic_0001>
module attributes {stable_mosaic.version = 11 : i64} {
  func.func @_stats_kernel(%arg0: i32, %arg1: memref<8x16xf32, #tpu.memory_space<vmem>>, %arg2: memref<8x32xf32, #tpu.memory_space<vmem>>, %arg3: memref<8x32xf32, #tpu.memory_space<vmem>>, %arg4: memref<8x128xf32, #tpu.memory_space<vmem>>, %arg5: memref<1x16xf32, #tpu.memory_space<vmem>>, %arg6: memref<1x32xf32, #tpu.memory_space<vmem>>, %arg7: memref<1x32xf32, #tpu.memory_space<vmem>>, %arg8: memref<1x128xf32, #tpu.memory_space<vmem>>, %arg9: memref<1x16xf32, #tpu.memory_space<vmem>>, %arg10: memref<1x32xf32, #tpu.memory_space<vmem>>, %arg11: memref<1x32xf32, #tpu.memory_space<vmem>>, %arg12: memref<1x128xf32, #tpu.memory_space<vmem>>) attributes {dimension_semantics = [#tpu.dimension_semantics<arbitrary>], iteration_bounds = array<i64: 1>, scalar_prefetch = 0 : i64, scratch_operands = 4 : i64, tpu.core_type = #tpu.core_type<tc>, window_params = [{transform_indices = @transform_0, window_bounds = array<i64: 8, 16>}, {transform_indices = @transform_1, window_bounds = array<i64: 8, 32>}, {transform_indices = @transform_2, window_bounds = array<i64: 8, 32>}, {transform_indices = @transform_3, window_bounds = array<i64: 8, 128>}, {pipeline_mode = #tpu.pipeline_mode<synchronous>, transform_indices = @transform_4, window_bounds = array<i64: 1, 16>}, {pipeline_mode = #tpu.pipeline_mode<synchronous>, transform_indices = @transform_5, window_bounds = array<i64: 1, 32>}, {pipeline_mode = #tpu.pipeline_mode<synchronous>, transform_indices = @transform_6, window_bounds = array<i64: 1, 32>}, {pipeline_mode = #tpu.pipeline_mode<synchronous>, transform_indices = @transform_7, window_bounds = array<i64: 1, 128>}]} {
    %c0_i32 = arith.constant 0 : i32
    %0 = arith.cmpi eq, %arg0, %c0_i32 : i32
    %1 = arith.extui %0 : i1 to i32
    %c0_i32_0 = arith.constant 0 : i32
    %2 = arith.cmpi ne, %1, %c0_i32_0 : i32
    scf.if %2 {
      %cst_29 = arith.constant 0.000000e+00 : f32
      %30 = vector.broadcast %cst_29 : f32 to vector<1x16xf32>
      %c0_30 = arith.constant 0 : index
      %c0_31 = arith.constant 0 : index
      %31 = vector.load %arg9[%c0_30, %c0_31] : memref<1x16xf32, #tpu.memory_space<vmem>>, vector<1x16xf32>
      tpu.vector_store %arg9[%c0_30, %c0_31], %30 {strides = array<i32>} : memref<1x16xf32, #tpu.memory_space<vmem>>, vector<1x16xf32>,
      %cst_32 = arith.constant 0.000000e+00 : f32
      %32 = vector.broadcast %cst_32 : f32 to vector<1x32xf32>
      %c0_33 = arith.constant 0 : index
      %c0_34 = arith.constant 0 : index
      %33 = vector.load %arg10[%c0_33, %c0_34] : memref<1x32xf32, #tpu.memory_space<vmem>>, vector<1x32xf32>
      tpu.vector_store %arg10[%c0_33, %c0_34], %32 {strides = array<i32>} : memref<1x32xf32, #tpu.memory_space<vmem>>, vector<1x32xf32>,
      %cst_35 = arith.constant 0.000000e+00 : f32
      %34 = vector.broadcast %cst_35 : f32 to vector<1x32xf32>
      %c0_36 = arith.constant 0 : index
      %c0_37 = arith.constant 0 : index
      %35 = vector.load %arg11[%c0_36, %c0_37] : memref<1x32xf32, #tpu.memory_space<vmem>>, vector<1x32xf32>
      tpu.vector_store %arg11[%c0_36, %c0_37], %34 {strides = array<i32>} : memref<1x32xf32, #tpu.memory_space<vmem>>, vector<1x32xf32>,
      %cst_38 = arith.constant 0.000000e+00 : f32
      %36 = vector.broadcast %cst_38 : f32 to vector<1x128xf32>
      %c0_39 = arith.constant 0 : index
      %c0_40 = arith.constant 0 : index
      %37 = vector.load %arg12[%c0_39, %c0_40] : memref<1x128xf32, #tpu.memory_space<vmem>>, vector<1x128xf32>
      tpu.vector_store %arg12[%c0_39, %c0_40], %36 {strides = array<i32>} : memref<1x128xf32, #tpu.memory_space<vmem>>, vector<1x128xf32>,
    } else {
    }
    %c0 = arith.constant 0 : index
    %c0_1 = arith.constant 0 : index
    %3 = vector.load %arg9[%c0, %c0_1] : memref<1x16xf32, #tpu.memory_space<vmem>>, vector<1x16xf32>
    %c0_2 = arith.constant 0 : index
    %c0_3 = arith.constant 0 : index
    %4 = vector.load %arg1[%c0_2, %c0_3] : memref<8x16xf32, #tpu.memory_space<vmem>>, vector<8x16xf32>
    %cst = arith.constant dense<0.000000e+00> : vector<16xf32>
    %5 = vector.multi_reduction <add>, %4, %cst [0] : vector<8x16xf32> to vector<16xf32>
    %6 = vector.shape_cast %5 : vector<16xf32> to vector<1x16xf32>
    %7 = arith.addf %3, %6 : vector<1x16xf32>
    %c0_4 = arith.constant 0 : index
    %c0_5 = arith.constant 0 : index
    %8 = vector.load %arg9[%c0_4, %c0_5] : memref<1x16xf32, #tpu.memory_space<vmem>>, vector<1x16xf32>
    tpu.vector_store %arg9[%c0_4, %c0_5], %7 {strides = array<i32>} : memref<1x16xf32, #tpu.memory_space<vmem>>, vector<1x16xf32>,
    %c0_6 = arith.constant 0 : index
    %c0_7 = arith.constant 0 : index
    %9 = vector.load %arg10[%c0_6, %c0_7] : memref<1x32xf32, #tpu.memory_space<vmem>>, vector<1x32xf32>
    %c0_8 = arith.constant 0 : index
    %c0_9 = arith.constant 0 : index
    %10 = vector.load %arg2[%c0_8, %c0_9] : memref<8x32xf32, #tpu.memory_space<vmem>>, vector<8x32xf32>
    %cst_10 = arith.constant dense<0.000000e+00> : vector<32xf32>
    %11 = vector.multi_reduction <add>, %10, %cst_10 [0] : vector<8x32xf32> to vector<32xf32>
    %12 = vector.shape_cast %11 : vector<32xf32> to vector<1x32xf32>
    %13 = arith.addf %9, %12 : vector<1x32xf32>
    %c0_11 = arith.constant 0 : index
    %c0_12 = arith.constant 0 : index
    %14 = vector.load %arg10[%c0_11, %c0_12] : memref<1x32xf32, #tpu.memory_space<vmem>>, vector<1x32xf32>
    tpu.vector_store %arg10[%c0_11, %c0_12], %13 {strides = array<i32>} : memref<1x32xf32, #tpu.memory_space<vmem>>, vector<1x32xf32>,
    %c0_13 = arith.constant 0 : index
    %c0_14 = arith.constant 0 : index
    %15 = vector.load %arg11[%c0_13, %c0_14] : memref<1x32xf32, #tpu.memory_space<vmem>>, vector<1x32xf32>
    %c0_15 = arith.constant 0 : index
    %c0_16 = arith.constant 0 : index
    %16 = vector.load %arg3[%c0_15, %c0_16] : memref<8x32xf32, #tpu.memory_space<vmem>>, vector<8x32xf32>
    %cst_17 = arith.constant dense<0.000000e+00> : vector<32xf32>
    %17 = vector.multi_reduction <add>, %16, %cst_17 [0] : vector<8x32xf32> to vector<32xf32>
    %18 = vector.shape_cast %17 : vector<32xf32> to vector<1x32xf32>
    %19 = arith.addf %15, %18 : vector<1x32xf32>
    %c0_18 = arith.constant 0 : index
    %c0_19 = arith.constant 0 : index
    %20 = vector.load %arg11[%c0_18, %c0_19] : memref<1x32xf32, #tpu.memory_space<vmem>>, vector<1x32xf32>
    tpu.vector_store %arg11[%c0_18, %c0_19], %19 {strides = array<i32>} : memref<1x32xf32, #tpu.memory_space<vmem>>, vector<1x32xf32>,
    %c0_20 = arith.constant 0 : index
    %c0_21 = arith.constant 0 : index
    %21 = vector.load %arg12[%c0_20, %c0_21] : memref<1x128xf32, #tpu.memory_space<vmem>>, vector<1x128xf32>
    %c0_22 = arith.constant 0 : index
    %c0_23 = arith.constant 0 : index
    %22 = vector.load %arg4[%c0_22, %c0_23] : memref<8x128xf32, #tpu.memory_space<vmem>>, vector<8x128xf32>
    %cst_24 = arith.constant dense<0.000000e+00> : vector<128xf32>
    %23 = vector.multi_reduction <add>, %22, %cst_24 [0] : vector<8x128xf32> to vector<128xf32>
    %24 = vector.shape_cast %23 : vector<128xf32> to vector<1x128xf32>
    %25 = arith.addf %21, %24 : vector<1x128xf32>
    %c0_25 = arith.constant 0 : index
    %c0_26 = arith.constant 0 : index
    %26 = vector.load %arg12[%c0_25, %c0_26] : memref<1x128xf32, #tpu.memory_space<vmem>>, vector<1x128xf32>
    tpu.vector_store %arg12[%c0_25, %c0_26], %25 {strides = array<i32>} : memref<1x128xf32, #tpu.memory_space<vmem>>, vector<1x128xf32>,
    %c0_i32_27 = arith.constant 0 : i32
    %27 = arith.cmpi eq, %arg0, %c0_i32_27 : i32
    %28 = arith.extui %27 : i1 to i32
    %c0_i32_28 = arith.constant 0 : i32
    %29 = arith.cmpi ne, %28, %c0_i32_28 : i32
    scf.if %29 {
      %c0_29 = arith.constant 0 : index
      %c0_30 = arith.constant 0 : index
      %30 = vector.load %arg9[%c0_29, %c0_30] : memref<1x16xf32, #tpu.memory_space<vmem>>, vector<1x16xf32>
      %cst_31 = arith.constant 1.250000e-01 : f32
      %31 = vector.broadcast %cst_31 : f32 to vector<1x16xf32>
      %32 = arith.mulf %30, %31 : vector<1x16xf32>
      %c0_32 = arith.constant 0 : index
      %c0_33 = arith.constant 0 : index
      %33 = vector.load %arg5[%c0_32, %c0_33] : memref<1x16xf32, #tpu.memory_space<vmem>>, vector<1x16xf32>
      tpu.vector_store %arg5[%c0_32, %c0_33], %32 {strides = array<i32>} : memref<1x16xf32, #tpu.memory_space<vmem>>, vector<1x16xf32>,
      %c0_34 = arith.constant 0 : index
      %c0_35 = arith.constant 0 : index
      %34 = vector.load %arg10[%c0_34, %c0_35] : memref<1x32xf32, #tpu.memory_space<vmem>>, vector<1x32xf32>
      %cst_36 = arith.constant 1.250000e-01 : f32
      %35 = vector.broadcast %cst_36 : f32 to vector<1x32xf32>
      %36 = arith.mulf %34, %35 : vector<1x32xf32>
      %c0_37 = arith.constant 0 : index
      %c0_38 = arith.constant 0 : index
      %37 = vector.load %arg6[%c0_37, %c0_38] : memref<1x32xf32, #tpu.memory_space<vmem>>, vector<1x32xf32>
      tpu.vector_store %arg6[%c0_37, %c0_38], %36 {strides = array<i32>} : memref<1x32xf32, #tpu.memory_space<vmem>>, vector<1x32xf32>,
      %c0_39 = arith.constant 0 : index
      %c0_40 = arith.constant 0 : index
      %38 = vector.load %arg11[%c0_39, %c0_40] : memref<1x32xf32, #tpu.memory_space<vmem>>, vector<1x32xf32>
      %cst_41 = arith.constant 1.250000e-01 : f32
      %39 = vector.broadcast %cst_41 : f32 to vector<1x32xf32>
      %40 = arith.mulf %38, %39 : vector<1x32xf32>
      %c0_42 = arith.constant 0 : index
      %c0_43 = arith.constant 0 : index
      %41 = vector.load %arg7[%c0_42, %c0_43] : memref<1x32xf32, #tpu.memory_space<vmem>>, vector<1x32xf32>
      tpu.vector_store %arg7[%c0_42, %c0_43], %40 {strides = array<i32>} : memref<1x32xf32, #tpu.memory_space<vmem>>, vector<1x32xf32>,
      %c0_44 = arith.constant 0 : index
      %c0_45 = arith.constant 0 : index
      %42 = vector.load %arg12[%c0_44, %c0_45] : memref<1x128xf32, #tpu.memory_space<vmem>>, vector<1x128xf32>
      %cst_46 = arith.constant 1.250000e-01 : f32
      %43 = vector.broadcast %cst_46 : f32 to vector<1x128xf32>
      %44 = arith.mulf %42, %43 : vector<1x128xf32>
      %c0_47 = arith.constant 0 : index
      %c0_48 = arith.constant 0 : index
      %45 = vector.load %arg8[%c0_47, %c0_48] : memref<1x128xf32, #tpu.memory_space<vmem>>, vector<1x128xf32>
      tpu.vector_store %arg8[%c0_47, %c0_48], %44 {strides = array<i32>} : memref<1x128xf32, #tpu.memory_space<vmem>>, vector<1x128xf32>,
    } else {
    }
    return
  }
  func.func @transform_0(%arg0: i32) -> (i32, i32) {
    %c0_i32 = arith.constant 0 : i32
    %c0_i32_0 = arith.constant 0 : i32
    return %arg0, %c0_i32 : i32, i32
  }
  func.func @transform_1(%arg0: i32) -> (i32, i32) {
    %c0_i32 = arith.constant 0 : i32
    %c0_i32_0 = arith.constant 0 : i32
    return %arg0, %c0_i32 : i32, i32
  }
  func.func @transform_2(%arg0: i32) -> (i32, i32) {
    %c0_i32 = arith.constant 0 : i32
    %c0_i32_0 = arith.constant 0 : i32
    return %arg0, %c0_i32 : i32, i32
  }
  func.func @transform_3(%arg0: i32) -> (i32, i32) {
    %c0_i32 = arith.constant 0 : i32
    %c0_i32_0 = arith.constant 0 : i32
    return %arg0, %c0_i32 : i32, i32
  }
  func.func @transform_4(%arg0: i32) -> (i32, i32) {
    %c0_i32 = arith.constant 0 : i32
    %c0_i32_0 = arith.constant 0 : i32
    %c0_i32_1 = arith.constant 0 : i32
    return %c0_i32, %c0_i32_0 : i32, i32
  }
  func.func @transform_5(%arg0: i32) -> (i32, i32) {
    %c0_i32 = arith.constant 0 : i32
    %c0_i32_0 = arith.constant 0 : i32
    %c0_i32_1 = arith.constant 0 : i32
    return %c0_i32, %c0_i32_0 : i32, i32
  }
  func.func @transform_6(%arg0: i32) -> (i32, i32) {
    %c0_i32 = arith.constant 0 : i32
    %c0_i32_0 = arith.constant 0 : i32
    %c0_i32_1 = arith.constant 0 : i32
    return %c0_i32, %c0_i32_0 : i32, i32
  }
  func.func @transform_7(%arg0: i32) -> (i32, i32) {
    %c0_i32 = arith.constant 0 : i32
    %c0_i32_0 = arith.constant 0 : i32
    %c0_i32_1 = arith.constant 0 : i32
    return %c0_i32, %c0_i32_0 : i32, i32
  }
}

</mosaic_0001>

<bundles_post_ra>
// kernel: tpu_custom_call.1
= control target key start
LH: loop header
LB: loop body
LE: loop exit
PB: predicated region body
PF: predicated region fallthrough
CT: control target
= control target key end

     0   :  { %13 = vsyncpa [#allocation7], 0  ;;  %s515_s0 = inlined_call_operand.hbm [shape: f32[8,16], index: 0, kind: input, shape index: {}]   ;;  %s516_s1 = inlined_call_operand.hbm [shape: f32[8,32], index: 1, kind: input, shape index: {}]   ;;  %s517_s2 = inlined_call_operand.hbm [shape: f32[8,32], index: 2, kind: input, shape index: {}]   ;;  %s518_s3 = inlined_call_operand.hbm [shape: f32[8,128], index: 3, kind: input, shape index: {}]   ;;  %s519_s4 = inlined_call_operand.hbm [shape: f32[1,16], index: 4, kind: output, shape index: {0}]   ;;  %s520_s5 = inlined_call_operand.hbm [shape: f32[1,32], index: 5, kind: output, shape index: {1}]   ;;  %s521_s6 = inlined_call_operand.hbm [shape: f32[1,32], index: 6, kind: output, shape index: {2}]   ;;  %s522_s7 = inlined_call_operand.hbm [shape: f32[1,128], index: 7, kind: output, shape index: {3}]  }
   0x1   :  { %14 = vsyncpa [#allocation10], 0 }
   0x2   :  { %15 = vsyncpa [#allocation13], 0 }
   0x3   :  { %16 = vsyncpa [#allocation8], 0 }
   0x4   :  { %17 = vsyncpa [#allocation16], 0  ;;  %s35_s26 = sshll.u32 %s516_s1, 4  ;;  %s36_s26 = int_to_ptr.hbm [resolvable:$true] %s35_s26 }
   0x5   :  { %18 = vsyncpa [#allocation19], 0  ;;  %s430_s27 = smov [#allocation9]   ;;  %s24_s8 = sshll.u32 %s515_s0, 4  ;;  %s25_s8 = int_to_ptr.hbm [resolvable:$true] %s24_s8 }
   0x6   :  { %s37_s28 = sshll.u32 %s430_s27, 4  ;;  %s431_s9 = smov [#allocation6]   ;;  %s38_s28 = int_to_ptr.vmem [resolvable:$true] %s37_s28 }
   0x7   :  { %40 = dma.hbm_to_vmem [thread:$0]  %s36_s26, 128, %s38_s28, [#allocation10]  }
   0x8   :  { %s26_s10 = sshll.u32 %s431_s9, 4  ;;  %s46_s13 = sshll.u32 %s517_s2, 4  ;;  %s27_s10 = int_to_ptr.vmem [resolvable:$true] %s26_s10  ;;  %s47_s13 = int_to_ptr.hbm [resolvable:$true] %s46_s13 }
   0x9   :  { %29 = dma.hbm_to_vmem [thread:$0]  %s25_s8, 128, %s27_s10, [#allocation7]  }
   0xa   :  { %s57_s15 = sshll.u32 %s518_s3, 4  ;;  %s432_s16 = smov [#allocation11]   ;;  %s58_s15 = int_to_ptr.hbm [resolvable:$true] %s57_s15 }
   0xb   :  { %s48_s17 = sshll.u32 %s432_s16, 4  ;;  %s433_s0 = smov [#allocation12]   ;;  %s49_s17 = int_to_ptr.vmem [resolvable:$true] %s48_s17 }
   0xc   :  { %51 = dma.hbm_to_vmem [thread:$0]  %s47_s13, 128, %s49_s17, [#allocation10]  }
   0xd   :  { %s59_s18 = sshll.u32 %s433_s0, 4  ;;  %s60_s18 = int_to_ptr.vmem [resolvable:$true] %s59_s18 }
   0xe   :  { %62 = dma.hbm_to_vmem [thread:$0]  %s58_s15, 128, %s60_s18, [#allocation13]  }
   0xf   :  { %418 = dma.done.wait [#allocation7], 128  }
  0x10   :  { %419 = vsyncadd [#allocation7], 4294967168 }
  0x11   :  { %420 = dma.done.wait [#allocation10], 256  }
  0x12   :  { %421 = vsyncadd [#allocation10], 4294967040 }
  0x13   :  { %422 = dma.done.wait [#allocation13], 128  }
  0x14   :  { %423 = vsyncadd [#allocation13], 4294967168  ;;  %vm85_vm0 = vcmask 253952   ;;  %v434_v0 = vmov 0.0   ;;  %vm83_vm1 = vcmask 122880   ;;  %vm104_vm2 = vcmask 261120  }
  0x15   :  { %86 = vst.msk [vmem:[#allocation3] sm:$0x1] %vm85_vm0, %v434_v0  ;;  %vm91_vm3 = vcmask 130048   ;;  %v103_v1 = vld [vmem:[#allocation9] sm:$0xff]  ;;  %v90_v2 = vld [vmem:[#allocation6] sm:$0xff]  ;;  %v116_v3 = vld [vmem:[#allocation11] sm:$0xff] }
  0x16   :  { %87 = vst.msk [vmem:[#allocation4] sm:$0x1] %vm85_vm0, %v434_v0  ;;  %v105_v4 = vsel %vm104_vm2, %v103_v1, 0.0  ;;  %v92_v5 = vsel %vm91_vm3, %v90_v2, 0.0  ;;  %v117_v6 = vsel %vm104_vm2, %v116_v3, 0.0  ;;  %v127_v7 = vld [vmem:[#allocation12] sm:$0xff] }
  0x17   :  { %88 = vst [vmem:[#allocation5] sm:$0x1] %v434_v0  ;;  %v106_v8 = vrot.slane %v105_v4, 4  ;;  %v93_v9 = vrot.slane %v92_v5, 4  ;;  %v118_v10 = vrot.slane %v117_v6, 4  ;;  %v128_v11 = vrot.slane %v127_v7, 4 }
  0x18   :  { %84 = vst.msk [vmem:[#allocation2] sm:$0x1] %vm83_vm1, %v434_v0  ;;  %s169_s19 = sshll.u32 %s520_s5, 4  ;;  %s435_s20 = smov [#allocation15]   ;;  %s170_s19 = int_to_ptr.hbm [resolvable:$true] %s169_s19 }
  0x19   :  { %v107_v12 = vadd.f32 %v106_v8, %v105_v4  ;;  %v94_v13 = vadd.f32 %v93_v9, %v92_v5  ;;  %v119_v14 = vadd.f32 %v118_v10, %v117_v6  ;;  %v129_v15 = vadd.f32 %v128_v11, %v127_v7  ;;  %s499_s21 = sshll.u32 %s435_s20, 4  ;;  %s436_s22 = smov [#allocation14]   ;;  %s168_s21 = int_to_ptr.vmem [resolvable:$true] %s499_s21 }
  0x1a   :  { %s156_s23 = sshll.u32 %s436_s22, 4  ;;  %s158_s26 = sshll.u32 %s519_s4, 4  ;;  %s157_s23 = int_to_ptr.vmem [resolvable:$true] %s156_s23  ;;  %s159_s26 = int_to_ptr.hbm [resolvable:$true] %s158_s26 }
  0x1b   :  { %v108_v16 = vrot.slane %v107_v12, 2  ;;  %v95_v17 = vrot.slane %v94_v13, 2  ;;  %v120_v18 = vrot.slane %v119_v14, 2  ;;  %v130_v19 = vrot.slane %v129_v15, 2  ;;  %s437_s27 = smov [#allocation17]   ;;  %s180_s30 = sshll.u32 %s521_s6, 4  ;;  %s181_s30 = int_to_ptr.hbm [resolvable:$true] %s180_s30 }
  0x1c   :  { %v102_v28 = vld [vmem:[#allocation3] sm:$0x1]  ;;  %s178_s28 = sshll.u32 %s437_s27, 4  ;;  %s438_s8 = smov [#allocation18]   ;;  %s179_s28 = int_to_ptr.vmem [resolvable:$true] %s178_s28 }
  0x1d   :  { %v109_v20 = vadd.f32 %v108_v16, %v107_v12  ;;  %v96_v21 = vadd.f32 %v95_v17, %v94_v13  ;;  %v121_v22 = vadd.f32 %v120_v18, %v119_v14  ;;  %v131_v23 = vadd.f32 %v130_v19, %v129_v15  ;;  %v115_v30 = vld [vmem:[#allocation4] sm:$0x1]  ;;  %s189_s9 = sshll.u32 %s438_s8, 4  ;;  %s191_s12 = sshll.u32 %s522_s7, 4  ;;  %s190_s9 = int_to_ptr.vmem [resolvable:$true] %s189_s9  ;;  %s192_s12 = int_to_ptr.hbm [resolvable:$true] %s191_s12 }
  0x1e   :  { %v126_v34 = vld [vmem:[#allocation5] sm:$0x1] }
  0x1f   :  { %v110_v24 = vrot.slane %v109_v20, 1  ;;  %v97_v25 = vrot.slane %v96_v21, 1  ;;  %v122_v26 = vrot.slane %v121_v22, 1  ;;  %v132_v27 = vrot.slane %v131_v23, 1  ;;  %v89_v29 = vld [vmem:[#allocation2] sm:$0x1] }
  0x21   :  { %v111_v31 = vadd.f32 %v110_v24, %v109_v20  ;;  %v98_v32 = vadd.f32 %v97_v25, %v96_v21  ;;  %v123_v33 = vadd.f32 %v122_v26, %v121_v22  ;;  %v133_v35 = vadd.f32 %v132_v27, %v131_v23 }
  0x23   :  { %v112_v36 = vadd.f32 %v111_v31, %v102_v28  ;;  %v99_v37 = vadd.f32 %v98_v32, %v89_v29  ;;  %v124_v38 = vadd.f32 %v123_v33, %v115_v30  ;;  %v134_v39 = vadd.f32 %v133_v35, %v126_v34 }
  0x25   :  { %114 = vst.msk [vmem:[#allocation3] sm:$0x1] %vm85_vm0, %v112_v36 }
  0x26   :  { %101 = vst.msk [vmem:[#allocation2] sm:$0x1] %vm83_vm1, %v99_v37 }
  0x27   :  { %125 = vst.msk [vmem:[#allocation4] sm:$0x1] %vm85_vm0, %v124_v38 }
  0x28   :  { %135 = vst [vmem:[#allocation5] sm:$0x1] %v134_v39 }
  0x2c   :  { %v142_v40 = vld [vmem:[#allocation3] sm:$0x1] }
  0x2d   :  { %v143_v41 = vmul.f32 0.125, %v142_v40  ;;  %v139_v42 = vld [vmem:[#allocation2] sm:$0x1] }
  0x2e   :  { %v140_v43 = vmul.f32 0.125, %v139_v42  ;;  %v145_v44 = vld [vmem:[#allocation4] sm:$0x1] }
  0x2f   :  { %144 = vst.msk [vmem:[#allocation15] sm:$0x1] %vm85_vm0, %v143_v41  ;;  %v146_v45 = vmul.f32 0.125, %v145_v44  ;;  %v148_v46 = vld [vmem:[#allocation5] sm:$0x1] }
  0x30   :  { %141 = vst.msk [vmem:[#allocation14] sm:$0x1] %vm83_vm1, %v140_v43  ;;  %v149_v47 = vmul.f32 0.125, %v148_v46  ;;  %172 = dma.vmem_to_hbm [thread:$0]  %s168_s21, 16, %s170_s19, [#allocation16]  }
  0x31   :  { %147 = vst.msk [vmem:[#allocation17] sm:$0x1] %vm85_vm0, %v146_v45  ;;  %161 = dma.vmem_to_hbm [thread:$0]  %s157_s23, 16, %s159_s26, [#allocation8]  }
  0x32   :  { %150 = vst [vmem:[#allocation18] sm:$0x1] %v149_v47  ;;  %183 = dma.vmem_to_hbm [thread:$0]  %s179_s28, 16, %s181_s30, [#allocation16]  }
  0x33   :  { %194 = dma.vmem_to_hbm [thread:$0]  %s190_s9, 16, %s192_s12, [#allocation19]  }
  0x34   :  { %424 = dma.done.wait [#allocation8], 16  }
  0x35   :  { %425 = vsyncadd [#allocation8], 4294967280 }
  0x36   :  { %426 = dma.done.wait [#allocation16], 32  }
  0x37   :  { %427 = vsyncadd [#allocation16], 4294967264 }
  0x38   :  { %428 = dma.done.wait [#allocation19], 16  }
  0x39   :  { %429 = vsyncadd [#allocation19], 4294967280 }
  0x3a   :  { %211 = vsyncpa [#allocation7], 1 }
  0x3b   :  { %212 = vsyncpa [#allocation10], 1 }
  0x3c   :  { %213 = vsyncpa [#allocation13], 1 }
  0x3d   :  { %214 = vsyncpa [#allocation8], 1 }
  0x3e   :  { %215 = vsyncpa [#allocation16], 1 }
  0x3f   :  { %216 = vsyncpa [#allocation19], 1 }

</bundles_post_ra>
